<compile_context>
chip_gen: v6e
topology: v6e:2x2x1
jax: 0.10.0
libtpu: 0.0.40
codegen_flags: <defaults>
</compile_context>

<pallas_src>
import functools

import jax
import jax.numpy as jnp
from jax import lax
from jax.experimental import pallas as pl
from jax.experimental.pallas import tpu as pltpu

LN_EPS = 1e-5


def _round_up(x, m):
    return (x + m - 1) // m * m


def crossnet_kernel(x_ref, w_ref, p_ref, o_ref, xi_ref, *, true_d):
    # One (batch-tile, layer) grid step.
    #   x_ref  : (TB, Dp)  zero-padded x_0 tile (resident across layer steps)
    #   w_ref  : (Dp, Dp)  this layer's W^T (zero-padded), streamed per layer
    #   p_ref  : (3, Dp)   packed [bias; gamma; beta] (zero in padded lanes)
    #   o_ref  : (TB, Dp)  output tile, written on the last layer step
    #   xi_ref : (TB, Dp)  f32 scratch carrying x_i across layer steps
    l = pl.program_id(1)

    @pl.when(l == 0)
    def _():
        xi_ref[...] = x_ref[...].astype(jnp.float32)

    x0 = x_ref[...].astype(jnp.float32)
    xi = xi_ref[...]

    params = p_ref[...].astype(jnp.float32)      # (3, Dp)
    bias = params[0:1, :]
    gamma = params[1:2, :]
    beta = params[2:3, :]

    # x_i @ W^T + b   (RHS already transposed -> contract its leading dim)
    xw = jnp.dot(xi, w_ref[...], preferred_element_type=jnp.float32) + bias

    # Cross interaction + residual.  Padded lanes of y are exactly zero
    # (x0, xw*x0, xi are all zero there), so full-lane sums == masked sums.
    y = x0 * xw + xi

    # Fused LayerNorm statistics (single pass over y): var = E[y^2] - mean^2.
    inv_d = jnp.float32(1.0 / true_d)
    s1 = jnp.sum(y, axis=-1, keepdims=True)
    s2 = jnp.sum(y * y, axis=-1, keepdims=True)
    mean = s1 * inv_d
    var = s2 * inv_d - mean * mean
    yhat = (y - mean) * lax.rsqrt(var + LN_EPS)

    # gamma/beta are zero in padded lanes -> x_i stays zero-padded.
    xi_new = yhat * gamma + beta
    xi_ref[...] = xi_new

    @pl.when(l == pl.num_programs(1) - 1)
    def _():
        o_ref[...] = xi_new.astype(o_ref.dtype)


def _pick_batch_tile(B, Dp, x_bytes):
    """Largest multiple-of-8 batch tile fitting a conservative VMEM budget."""
    budget = 40 * 2**20                                # leave headroom on v7x (64 MiB)
    w_buf = 2 * Dp * Dp * 4                            # weight double-buffer (f32)
    p_buf = 2 * 8 * Dp * 4                             # packed params (padded sublanes)
    per_row = Dp * (2 * x_bytes + 2 * x_bytes + 4)     # x dbuf + out dbuf + xi scratch
    avail = max(budget - w_buf - p_buf, 8 * per_row)
    tb = min(512, avail // per_row, _round_up(max(B, 1), 8))
    tb = max(8, (int(tb) // 8) * 8)
    if tb >= 128:
        tb = (tb // 128) * 128                         # prefer 128-multiples
    return tb


def crossnet_pallas(x, W, b, gamma, beta):
    """CrossNet forward.  x:(B,D), W:(L,D,D), b:(L,D), gamma:(L,D), beta:(L,D)."""
    B, D = x.shape
    L = W.shape[0]

    Dp = _round_up(D, 128)                             # lane-dense feature axis
    x_bytes = jnp.dtype(x.dtype).itemsize
    tb = _pick_batch_tile(B, Dp, x_bytes)
    Bp = _round_up(B, tb)
    nb = Bp // tb

    f32 = jnp.float32
    # One-time layout plumbing in the wrapper: zero-pad, pre-transpose W,
    # and pack bias/gamma/beta into one (L, 3, Dp) tensor.
    x_p = jnp.zeros((Bp, Dp), x.dtype).at[:B, :D].set(x)
    Wt_p = jnp.zeros((L, Dp, Dp), f32).at[:, :D, :D].set(
        jnp.swapaxes(W, 1, 2).astype(f32))
    p_all = jnp.zeros((L, 3, Dp), f32)
    p_all = p_all.at[:, 0, :D].set(b.astype(f32))
    p_all = p_all.at[:, 1, :D].set(gamma.astype(f32))
    p_all = p_all.at[:, 2, :D].set(beta.astype(f32))

    kernel = functools.partial(crossnet_kernel, true_d=D)

    est_vmem = (2 * Dp * Dp * 4                        # W double-buffer
                + 2 * 8 * Dp * 4                       # packed params (padded rows)
                + 2 * tb * Dp * x_bytes                # x tile double-buffer
                + 2 * tb * Dp * x_bytes                # out tile double-buffer
                + tb * Dp * 4)                         # x_i scratch
    vmem_limit = int(min(56 * 2**20, max(16 * 2**20, 2 * est_vmem)))

    cost = pl.CostEstimate(
        flops=2 * Bp * Dp * Dp * L + 10 * Bp * Dp * L,
        transcendentals=Bp * L,
        bytes_accessed=(2 * Bp * Dp * x_bytes
                        + nb * L * Dp * Dp * 4
                        + nb * L * 3 * Dp * 4),
    )

    out_p = pl.pallas_call(
        kernel,
        out_shape=jax.ShapeDtypeStruct((Bp, Dp), x.dtype),
        grid_spec=pltpu.PrefetchScalarGridSpec(
            num_scalar_prefetch=0,
            grid=(nb, L),                                               # layers innermost
            in_specs=[
                pl.BlockSpec((tb, Dp), lambda i, l: (i, 0)),            # x_0 (resident over l)
                pl.BlockSpec((None, Dp, Dp), lambda i, l: (l, 0, 0)),   # W_l^T streamed
                pl.BlockSpec((None, 3, Dp), lambda i, l: (l, 0, 0)),    # [b; gamma; beta]_l
            ],
            out_specs=pl.BlockSpec((tb, Dp), lambda i, l: (i, 0)),      # resident over l
            scratch_shapes=[pltpu.VMEM((tb, Dp), jnp.float32)],         # x_i carry
        ),
        compiler_params=pltpu.CompilerParams(
            dimension_semantics=("parallel", "arbitrary"),
            vmem_limit_bytes=vmem_limit,
        ),
        cost_estimate=cost,
    )(x_p, Wt_p, p_all)

    return out_p[:B, :D]


def crossnet_ref(x, W, b, gamma, beta):
    # Pure-JAX reference mirroring the torch forward exactly.
    x0 = x.astype(jnp.float32)
    xi = x0
    for i in range(W.shape[0]):
        xw = jnp.matmul(W[i], xi.T) + b[i].reshape(-1, 1)   # (D, B)
        y = x0 * xw.T + xi
        mean = jnp.mean(y, axis=-1, keepdims=True)
        var = jnp.mean((y - mean) ** 2, axis=-1, keepdims=True)
        yhat = (y - mean) / jnp.sqrt(var + LN_EPS)
        xi = yhat * gamma[i].reshape(1, -1) + beta[i].reshape(1, -1)
    return xi.astype(x.dtype)


if __name__ == "__main__":
    B, D, L = 8, 32, 3  # batch, n_input, n_layers

    key = jax.random.PRNGKey(0)
    kx, kw, kb = jax.random.split(key, 3)

    x = jax.random.normal(kx, (B, D), dtype=jnp.float32)
    # Parameters: torch.randn(n_input, n_input) / torch.randn(n_input, 1)
    W = jax.random.normal(kw, (L, D, D), dtype=jnp.float32)
    b = jax.random.normal(kb, (L, D, 1), dtype=jnp.float32)
    # nn.LayerNorm default init: weight=1, bias=0
    gamma = jnp.ones((L, D), dtype=jnp.float32)
    beta = jnp.zeros((L, D), dtype=jnp.float32)

    out = crossnet_pallas(x, W, b.reshape(L, D), gamma, beta)
    out = jax.block_until_ready(out)

    ref = crossnet_ref(x, W, b.reshape(L, D), gamma, beta)
    assert jnp.allclose(out, ref, atol=1e-4, rtol=1e-4), "mismatch vs reference"

    print("KERNEL_OK")
</pallas_src>

<mosaic_0001>
module attributes {stable_mosaic.version = 11 : i64} {
  func.func @crossnet_kernel(%arg0: i32, %arg1: i32, %arg2: memref<8x128xf32, #tpu.memory_space<vmem>>, %arg3: memref<1x128x128xf32, #tpu.memory_space<vmem>>, %arg4: memref<1x3x128xf32, #tpu.memory_space<vmem>>, %arg5: memref<8x128xf32, #tpu.memory_space<vmem>>, %arg6: memref<8x128xf32, #tpu.memory_space<vmem>>) attributes {dimension_semantics = [#tpu.dimension_semantics<parallel>, #tpu.dimension_semantics<arbitrary>], iteration_bounds = array<i64: 1, 3>, scalar_prefetch = 0 : i64, scratch_operands = 1 : i64, tpu.core_type = #tpu.core_type<tc>, window_params = [{transform_indices = @transform_0, window_bounds = array<i64: 8, 128>}, {transform_indices = @transform_1, window_bounds = array<i64: 1, 128, 128>}, {transform_indices = @transform_2, window_bounds = array<i64: 1, 3, 128>}, {transform_indices = @transform_3, window_bounds = array<i64: 8, 128>}]} {
    %c0_i32 = arith.constant 0 : i32
    %0 = arith.cmpi eq, %arg1, %c0_i32 : i32
    %1 = arith.extui %0 : i1 to i32
    %c0_i32_0 = arith.constant 0 : i32
    %2 = arith.cmpi ne, %1, %c0_i32_0 : i32
    scf.if %2 {
      %c0_18 = arith.constant 0 : index
      %c0_19 = arith.constant 0 : index
      %43 = vector.load %arg2[%c0_18, %c0_19] : memref<8x128xf32, #tpu.memory_space<vmem>>, vector<8x128xf32>
      %c0_20 = arith.constant 0 : index
      %c0_21 = arith.constant 0 : index
      %44 = vector.load %arg6[%c0_20, %c0_21] : memref<8x128xf32, #tpu.memory_space<vmem>>, vector<8x128xf32>
      tpu.vector_store %arg6[%c0_20, %c0_21], %43 {strides = array<i32>} : memref<8x128xf32, #tpu.memory_space<vmem>>, vector<8x128xf32>,
    } else {
    }
    %c0 = arith.constant 0 : index
    %c0_1 = arith.constant 0 : index
    %3 = vector.load %arg2[%c0, %c0_1] : memref<8x128xf32, #tpu.memory_space<vmem>>, vector<8x128xf32>
    %c0_2 = arith.constant 0 : index
    %c0_3 = arith.constant 0 : index
    %4 = vector.load %arg6[%c0_2, %c0_3] : memref<8x128xf32, #tpu.memory_space<vmem>>, vector<8x128xf32>
    %c0_4 = arith.constant 0 : index
    %c0_5 = arith.constant 0 : index
    %c0_6 = arith.constant 0 : index
    %5 = vector.load %arg4[%c0_4, %c0_5, %c0_6] : memref<1x3x128xf32, #tpu.memory_space<vmem>>, vector<1x3x128xf32>
    %6 = vector.shape_cast %5 : vector<1x3x128xf32> to vector<3x128xf32>
    %7 = vector.extract_strided_slice %6 {offsets = [0, 0], sizes = [1, 128], strides = [1, 1]} : vector<3x128xf32> to vector<1x128xf32>
    %8 = vector.extract_strided_slice %6 {offsets = [1, 0], sizes = [1, 128], strides = [1, 1]} : vector<3x128xf32> to vector<1x128xf32>
    %9 = vector.extract_strided_slice %6 {offsets = [2, 0], sizes = [1, 128], strides = [1, 1]} : vector<3x128xf32> to vector<1x128xf32>
    %c0_7 = arith.constant 0 : index
    %c0_8 = arith.constant 0 : index
    %c0_9 = arith.constant 0 : index
    %10 = vector.load %arg3[%c0_7, %c0_8, %c0_9] : memref<1x128x128xf32, #tpu.memory_space<vmem>>, vector<1x128x128xf32>
    %11 = vector.shape_cast %10 : vector<1x128x128xf32> to vector<128x128xf32>
    %cst = arith.constant dense<0.000000e+00> : vector<8x128xf32>
    %12 = tpu.matmul %4, %11, %cst {dimension_numbers = #tpu.dot_dimension_numbers<[1], [0], [0], [1], [0, 0, 1, 1], [], []>} : vector<8x128xf32>, vector<128x128xf32>, vector<8x128xf32> -> vector<8x128xf32>
    %13 = vector.broadcast %7 : vector<1x128xf32> to vector<8x128xf32>
    %14 = arith.addf %12, %13 : vector<8x128xf32>
    %15 = arith.mulf %3, %14 : vector<8x128xf32>
    %16 = arith.addf %15, %4 : vector<8x128xf32>
    %cst_10 = arith.constant dense<0.000000e+00> : vector<8xf32>
    %17 = vector.multi_reduction <add>, %16, %cst_10 [1] : vector<8x128xf32> to vector<8xf32>
    %18 = vector.shape_cast %17 : vector<8xf32> to vector<8x1xf32>
    %19 = arith.mulf %16, %16 : vector<8x128xf32>
    %cst_11 = arith.constant dense<0.000000e+00> : vector<8xf32>
    %20 = vector.multi_reduction <add>, %19, %cst_11 [1] : vector<8x128xf32> to vector<8xf32>
    %21 = vector.shape_cast %20 : vector<8xf32> to vector<8x1xf32>
    %cst_12 = arith.constant 3.125000e-02 : f32
    %22 = vector.broadcast %cst_12 : f32 to vector<8x1xf32>
    %23 = arith.mulf %18, %22 : vector<8x1xf32>
    %cst_13 = arith.constant 3.125000e-02 : f32
    %24 = vector.broadcast %cst_13 : f32 to vector<8x1xf32>
    %25 = arith.mulf %21, %24 : vector<8x1xf32>
    %26 = arith.mulf %23, %23 : vector<8x1xf32>
    %27 = arith.subf %25, %26 : vector<8x1xf32>
    %28 = vector.broadcast %23 : vector<8x1xf32> to vector<8x128xf32>
    %29 = arith.subf %16, %28 : vector<8x128xf32>
    %cst_14 = arith.constant 9.99999974E-6 : f32
    %30 = vector.broadcast %cst_14 : f32 to vector<8x1xf32>
    %31 = arith.addf %27, %30 : vector<8x1xf32>
    %32 = math.rsqrt %31 : vector<8x1xf32>
    %33 = vector.broadcast %32 : vector<8x1xf32> to vector<8x128xf32>
    %34 = arith.mulf %29, %33 : vector<8x128xf32>
    %35 = vector.broadcast %8 : vector<1x128xf32> to vector<8x128xf32>
    %36 = arith.mulf %34, %35 : vector<8x128xf32>
    %37 = vector.broadcast %9 : vector<1x128xf32> to vector<8x128xf32>
    %38 = arith.addf %36, %37 : vector<8x128xf32>
    %c0_15 = arith.constant 0 : index
    %c0_16 = arith.constant 0 : index
    %39 = vector.load %arg6[%c0_15, %c0_16] : memref<8x128xf32, #tpu.memory_space<vmem>>, vector<8x128xf32>
    tpu.vector_store %arg6[%c0_15, %c0_16], %38 {strides = array<i32>} : memref<8x128xf32, #tpu.memory_space<vmem>>, vector<8x128xf32>,
    %c2_i32 = arith.constant 2 : i32
    %40 = arith.cmpi eq, %arg1, %c2_i32 : i32
    %41 = arith.extui %40 : i1 to i32
    %c0_i32_17 = arith.constant 0 : i32
    %42 = arith.cmpi ne, %41, %c0_i32_17 : i32
    scf.if %42 {
      %c0_18 = arith.constant 0 : index
      %c0_19 = arith.constant 0 : index
      %43 = vector.load %arg5[%c0_18, %c0_19] : memref<8x128xf32, #tpu.memory_space<vmem>>, vector<8x128xf32>
      tpu.vector_store %arg5[%c0_18, %c0_19], %38 {strides = array<i32>} : memref<8x128xf32, #tpu.memory_space<vmem>>, vector<8x128xf32>,
    } else {
    }
    return
  }
  func.func @transform_0(%arg0: i32, %arg1: i32) -> (i32, i32) {
    %c0_i32 = arith.constant 0 : i32
    %c0_i32_0 = arith.constant 0 : i32
    return %arg0, %c0_i32 : i32, i32
  }
  func.func @transform_1(%arg0: i32, %arg1: i32) -> (i32, i32, i32) {
    %c0_i32 = arith.constant 0 : i32
    %c0_i32_0 = arith.constant 0 : i32
    %c0_i32_1 = arith.constant 0 : i32
    return %arg1, %c0_i32, %c0_i32_0 : i32, i32, i32
  }
  func.func @transform_2(%arg0: i32, %arg1: i32) -> (i32, i32, i32) {
    %c0_i32 = arith.constant 0 : i32
    %c0_i32_0 = arith.constant 0 : i32
    %c0_i32_1 = arith.constant 0 : i32
    return %arg1, %c0_i32, %c0_i32_0 : i32, i32, i32
  }
  func.func @transform_3(%arg0: i32, %arg1: i32) -> (i32, i32) {
    %c0_i32 = arith.constant 0 : i32
    %c0_i32_0 = arith.constant 0 : i32
    return %arg0, %c0_i32 : i32, i32
  }
}

</mosaic_0001>

<bundles_post_ra>
// kernel: tpu_custom_call.1
= control target key start
LH: loop header
LB: loop body
LE: loop exit
PB: predicated region body
PF: predicated region fallthrough
CT: control target
= control target key end

     0   :  { %8 = vsyncpa [#allocation4], 0  ;;  %s1012_s0 = inlined_call_operand.hbm [shape: f32[8,128], index: 0, kind: input, shape index: {}]   ;;  %s1013_s1 = inlined_call_operand.hbm [shape: f32[3,128,128], index: 1, kind: input, shape index: {}]   ;;  %s1014_s2 = inlined_call_operand.hbm [shape: f32[3,3,128], index: 2, kind: input, shape index: {}]   ;;  %s1015_s3 = inlined_call_operand.hbm [shape: f32[8,128], index: 3, kind: output, shape index: {}]  }
   0x1   :  { %9 = vsyncpa [#allocation7], 0 }
   0x2   :  { %11 = vsyncpa [#allocation7 + $0x1], 0 }
   0x3   :  { %12 = vsyncpa [#allocation5], 0  ;;  %s832_s12 = smov 0   ;;  %s834_s13 = smov 0  }
   0x4   :  { %s836_s14 = smov 0   ;;  %s838_s15 = smov 0  }
   0x5   :  { %s840_s16 = smov 0   ;;  %s842_s17 = smov 0  }
   0x6 LB: > { %s27_s18 = sadd.s32 1, %s798_s16  ;;  %s63_s19 = sadd.s32 1, %s790_s14  ;;  %s802_s17 = sphi %s842_s17, %s18_s17   ;;  %s798_s16 = sphi %s840_s16, %s1031_s16   ;;  %s794_s15 = sphi %s838_s15, %s1030_s15   ;;  %s790_s14 = sphi %s836_s14, %s1029_s14   ;;  %s786_s13 = sphi %s834_s13, %s1028_s13   ;;  %s782_s12 = sphi %s832_s12, %s1027_s12  }
   0x7   : > { %p28_p0 = scmp.ge.s32.totalorder %s27_s18, 3  ;;  %p70_p1 = scmp.ne.s32.totalorder %s790_s14, %s786_s13 }
   0x8   : > { %p71_p2 = scmp.eq.s32.totalorder %s802_s17, 0  ;;  %p578_p4 = scmp.lt.s32.totalorder %s802_s17, 3 }
   0x9   : > { %s1033_s18 = smov (%p28_p0, %s27_s18), 0  ;;  %s165_s21 = sand.u32 1, %s802_s17  }
   0xa   : > { %p72_p3 = por %p71_p2, %p70_p1  ;;  %s60_s20 = ssub.s32 %s798_s16, %s1033_s18 }
   0xb   : > { %p61_p5 = scmp.eq.s32.totalorder %s60_s20, 0  ;;  %s167_s22 = sand.u32 1, %s790_s14  }
   0xc   : > { %s501_s23 = sshll.u32 %s798_s16, 11  ;;  %s486_s25 = sshll.u32 %s167_s22, 7 }
   0xd   : > { %s876_s24 = scalar_select %p61_p5, %s790_s14, %s63_s19  }
   0xe   : > { %s175_s28 = scalar_lea.hbm %s1013_s1, %s501_s23  ;;  %p883_p6 = pnand %p578_p4, %p72_p3 }
   0xf   : > { %s169_s30 = scalar_lea.vmem [#allocation6], %s486_s25  ;;  %s887_s5 = scalar_lea.sflag [#allocation7], %s165_s21 }
  0x10   : > { %s176_s4 = sshll.u32 %s169_s30, 4  ;;  %p640_p7 = pneg %p883_p6  ;;  %s177_s4 = int_to_ptr.vmem [resolvable:$true] %s176_s4 }
  0x11   : > { %s651_s6 = scalar_lea.vmem %s177_s4, 2048  ;;  %s804_s7 = smov [#allocation6]  }
  0x12   : > { %p652_p8 = scmp.ne.s32.totalorder %s177_s4, %s651_s6  ;;  %s656_s8 = sshll.u32 %s804_s7, 4  ;;  %s657_s8 = int_to_ptr.vmem [resolvable:$false] %s656_s8 }
  0x13   : > { %s658_s9 = scalar_lea.vmem %s657_s8, 4096  ;;  %p659_p11 = scmp.lt.s32.totalorder %s177_s4, %s657_s8 }
  0x14   : > { %p654_p9 = pnand %p652_p8, %p640_p7  ;;  %p660_p12 = scmp.lt.s32.totalorder %s658_s9, %s651_s6 }
  0x16   : > { %p655_p10 = pneg %p654_p9  ;;  %p661_p13 = por %p660_p12, %p659_p11 }
  0x18   : > { %p662_p0 = pnand %p661_p13, %p655_p10 }
  0x1a   : > { %665 = shalt.err (!%p662_p0)
}
  0x1b   : > { %s805_s10 = smov 128   ;;  %s806_s11 = smov 8  }
  0x1c   : > { %573 = dma.hbm_to_vmem [thread:$0]  (!%p883_p6), %s175_s28, 2048, %s177_s4, %s887_s5, %s805_s10, %s805_s10, %s806_s11  }
  0x1d   : > { %s898_s19 = sadd.s32 4294967295, %s802_s17   ;;  %p76_p1 = scmp.ne.s32.totalorder %s786_s13, %s782_s12 }
  0x1e   : > { %p1016_p2 = scmp.eq.s32.totalorder %s898_s19, 0  ;;  %p483_p3 = scmp.ge.s32.totalorder %s802_s17, 1 }
  0x1f   : > { %p139_p4 = scmp.lt.s32.totalorder %s802_s17, 4  ;;  %s807_s23 = smov [#allocation3]  }
  0x20   : > { %p907_p5 = por %p1016_p2, %p76_p1  ;;  %s154_s25 = sshll.u32 %s807_s23, 4  ;;  %s155_s25 = int_to_ptr.vmem [resolvable:$true] %s154_s25 }
  0x21   : > { %p911_p8 = pnand %p483_p3, %p139_p4  ;;  %s489_s26 = sshll.u32 %s167_s22, 2 }
  0x22   : > { %s1020_s20 = scalar_select %p907_p5, 1, 0 }
  0x23   : > { %s1021_s21 = scalar_select %p911_p8, 1, 0 }
  0x24   : > { %p566_p9 = pneg %p911_p8  ;;  %s490_s12 = sshll.u32 %s798_s16, 6 }
  0x25   : > { %s929_s4 = scalar_lea.hbm %s1014_s2, %s490_s12  ;;  %s190_s6 = scalar_lea.vmem [#allocation8], %s489_s26 }
  0x26   : > { %p922_p10 = pnand %p566_p9, %p1016_p2  ;;  %s197_s7 = sshll.u32 %s190_s6, 4  ;;  %s198_s7 = int_to_ptr.vmem [resolvable:$true] %s197_s7 }
  0x27   : > { %s677_s22 = scalar_lea.vmem %s155_s25, 128  ;;  %p685_p1 = scmp.lt.s32.totalorder %s155_s25, %s155_s25 }
  0x28   : > { %p668_p11 = pneg %p922_p10  ;;  %p678_p12 = scmp.ne.s32.totalorder %s155_s25, %s677_s22 }
  0x29   : > { %p686_p3 = scmp.lt.s32.totalorder %s677_s22, %s677_s22 }
  0x2a   : > { %p680_p13 = pnand %p678_p12, %p668_p11 }
  0x2b   : > { %p687_p4 = por %p686_p3, %p685_p1 }
  0x2c   : > { %p681_p0 = pneg %p680_p13 }
  0x2e   : > { %p688_p9 = pnand %p687_p4, %p681_p0 }
  0x30   : > { %691 = shalt.err (!%p688_p9)
}
  0x31   : > { %569 = dma.hbm_to_vmem [thread:$0]  (!%p922_p10), %s1012_s0, 128, %s155_s25, [#allocation4]  }
  0x32   : > { %s705_s10 = scalar_lea.vmem %s198_s7, 64  ;;  %s808_s11 = smov [#allocation8]  }
  0x33   : > { %p706_p2 = scmp.ne.s32.totalorder %s198_s7, %s705_s10  ;;  %s710_s23 = sshll.u32 %s808_s11, 4  ;;  %s711_s23 = int_to_ptr.vmem [resolvable:$false] %s710_s23 }
  0x34   : > { %s712_s26 = scalar_lea.vmem %s711_s23, 128  ;;  %p713_p11 = scmp.lt.s32.totalorder %s198_s7, %s711_s23 }
  0x35   : > { %p708_p5 = pnand %p706_p2, %p640_p7  ;;  %p714_p12 = scmp.lt.s32.totalorder %s712_s26, %s705_s10 }
  0x37   : > { %p709_p8 = pneg %p708_p5  ;;  %p715_p13 = por %p714_p12, %p713_p11 }
  0x39   : > { %p716_p0 = pnand %p715_p13, %p709_p8 }
  0x3b   : > { %719 = shalt.err (!%p716_p0)
}
  0x3c   : > { %576 = dma.hbm_to_vmem [thread:$0]  (!%p883_p6), %s929_s4, 64, %s198_s7, %s887_s5  }
  0x3d   : > { %p1023_p10 = scmp.ne.s32.totalorder %s1021_s21, 0 }
  0x3e   : > { %p1024_p7 = scmp.eq.s32.totalorder (!%p1023_p10), %s898_s19, 0 }
  0x3f   : > { %206 = sbr.rel (%p1023_p10) target bundleno = 500 (0x1f4), region = 32 }
  0x44   : > { %769 = dma.done.wait (%p1024_p7), [#allocation4], 128   ;;  %p1025_p2 = pmov %p1024_p7 }
  0x45   : > { %s212_s25 = sand.u32 1, %s898_s19   ;;  %s214_s12 = sand.u32 1, %s786_s13  }
  0x46   : > { %771 = vsyncadd (%p1025_p2), [#allocation4], 4294967168  ;;  %s493_s27 = sshll.u32 %s214_s12, 7  ;;  %s213_s28 = scalar_lea.sflag [#allocation7], %s212_s25 }
  0x47   : > { %s953_s29 = scalar_lea.vmem [#allocation6], %s493_s27  ;;  %p1026_p5 = scmp.ne.s32.totalorder %s1020_s20, 0 }
  0x49   : > { %773 = dma.done.wait (%p1026_p5), %s213_s28, 2112  }
  0x4a   : > { %775 = vsyncadd (%p1026_p5), %s213_s28, 4294965184  ;;  %s959_s5 = sshll.u32 %s214_s12, 2  ;;  %p495_p6 = scmp.ne.s32.totalorder %s794_s15, 0 }
  0x4b   : > { %s225_s21 = scalar_lea.vmem [#allocation8], %s959_s5 }
  0x4c   : > { %251 = sbr.rel (%p495_p6) target bundleno = 83 (0x53), region = 48 }
  0x51   : > { %v252_v0 = vld [vmem:[#allocation3] sm:$0xff] }
  0x52   : > { %253 = vst [vmem:[#allocation2] sm:$0xff] %v252_v0 }
  0x53 PF: > { %v272_v1 = vld [vmem:[%s953_s29 + $0x78] sm:$0xff]  ;;  %v809_v2 = vmov 0.0   ;;  %v271_v3 = vld [vmem:[%s953_s29 + $0x70] sm:$0xff]  ;;  %vm810_vm0 = vmmov 0   ;;  %v270_v4 = vld [vmem:[%s953_s29 + $0x68] sm:$0xff]  ;;  %v273_v19 = vlaneseq  ;;  %p496_p8 = scmp.ne.s32.totalorder %s794_s15, 2 }
  0x54   : > { %519 = vmatprep.subr.mxu0 %v809_v2  ;;  %551 = vmatprep.mubr.msk.f32.mxu0 %vm810_vm0, %v809_v2  ;;  %v269_v5 = vld [vmem:[%s953_s29 + $0x60] sm:$0xff]  ;;  %v268_v6 = vld [vmem:[%s953_s29 + $0x58] sm:$0xff]  ;;  %v267_v7 = vld [vmem:[%s953_s29 + $0x50] sm:$0xff] }
  0x55   : > { %520 = vmatpush3.msra.mxu0 %v272_v1  ;;  %v266_v8 = vld [vmem:[%s953_s29 + $0x48] sm:$0xff]  ;;  %v265_v9 = vld [vmem:[%s953_s29 + $0x40] sm:$0xff]  ;;  %v264_v10 = vld [vmem:[%s953_s29 + $0x38] sm:$0xff]  ;;  %v274_v20 = vshrl.u32 %v273_v19, 7 }
  0x56   : > { %521 = vmatprep.subr.mxu0 %v809_v2  ;;  %v263_v11 = vld [vmem:[%s953_s29 + $0x30] sm:$0xff]  ;;  %v262_v12 = vld [vmem:[%s953_s29 + $0x28] sm:$0xff]  ;;  %v261_v13 = vld [vmem:[%s953_s29 + $0x20] sm:$0xff] }
  0x57   : > { %522 = vmatpush3.msra.mxu0 %v271_v3  ;;  %v260_v14 = vld [vmem:[%s953_s29 + $0x18] sm:$0xff]  ;;  %v259_v15 = vld [vmem:[%s953_s29 + $0x10] sm:$0xff]  ;;  %v258_v16 = vld [vmem:[%s953_s29 + $0x8] sm:$0xff]  ;;  %v275_v21 = vsub.s32 0, %v274_v20  ;;  %v364_v38 = vsub.s32 1, %v274_v20  ;;  %v369_v39 = vsub.s32 2, %v274_v20 }
  0x58   : > { %523 = vmatprep.subr.mxu0 %v809_v2  ;;  %v257_v17 = vld [vmem:[%s953_s29] sm:$0xff]  ;;  %v254_v24 = vld [vmem:[#allocation3] sm:$0xff] }
  0x59   : > { %524 = vmatpush3.msra.mxu0 %v270_v4  ;;  %v255_v18 = vld [vmem:[#allocation2] sm:$0xff]  ;;  %v256_v22 = vld [vmem:[%s225_s21] sm:$0x7] }
  0x5a   : > { %525 = vmatprep.subr.mxu0 %v809_v2  ;;  %v276_v23 = vrot.slane %v256_v22, %v275_v21  ;;  %v365_v40 = vrot.slane %v256_v22, %v364_v38  ;;  %v370_v43 = vrot.slane %v256_v22, %v369_v39 }
  0x5b   : > { %526 = vmatpush3.msra.mxu0 %v269_v5 }
  0x5c   : > { %527 = vmatprep.subr.mxu0 %v809_v2 }
  0x5d   : > { %528 = vmatpush3.msra.mxu0 %v268_v6 }
  0x5e   : > { %529 = vmatprep.subr.mxu0 %v809_v2 }
  0x5f   : > { %530 = vmatpush3.msra.mxu0 %v267_v7 }
  0x60   : > { %531 = vmatprep.subr.mxu0 %v809_v2 }
  0x61   : > { %532 = vmatpush3.msra.mxu0 %v266_v8 }
  0x62   : > { %533 = vmatprep.subr.mxu0 %v809_v2 }
  0x63   : > { %534 = vmatpush3.msra.mxu0 %v265_v9 }
  0x64   : > { %535 = vmatprep.subr.mxu0 %v809_v2 }
  0x65   : > { %536 = vmatpush3.msra.mxu0 %v264_v10 }
  0x66   : > { %537 = vmatprep.subr.mxu0 %v809_v2 }
  0x67   : > { %538 = vmatpush3.msra.mxu0 %v263_v11 }
  0x68   : > { %539 = vmatprep.subr.mxu0 %v809_v2 }
  0x69   : > { %540 = vmatpush3.msra.mxu0 %v262_v12 }
  0x6a   : > { %541 = vmatprep.subr.mxu0 %v809_v2 }
  0x6b   : > { %542 = vmatpush3.msra.mxu0 %v261_v13 }
  0x6c   : > { %543 = vmatprep.subr.mxu0 %v809_v2 }
  0x6d   : > { %544 = vmatpush3.msra.mxu0 %v260_v14 }
  0x6e   : > { %545 = vmatprep.subr.mxu0 %v809_v2 }
  0x6f   : > { %546 = vmatpush3.msra.mxu0 %v259_v15 }
  0x70   : > { %547 = vmatprep.subr.mxu0 %v809_v2 }
  0x71   : > { %548 = vmatpush3.msra.mxu0 %v258_v16 }
  0x72   : > { %549 = vmatprep.subr.mxu0 %v809_v2 }
  0x73   : > { %550 = vmatpush3.msra.mxu0 %v257_v17 }
  0x74   : > { %552 = vmatmul.mubr.f32.vlgmr.msra.gmra.mxu0 %v255_v18 }
 0x134   : > { %v343_v25 = vpop.f32.mrf.mxu0 }
 0x135   : > { %v344_v26 = vadd.f32 %v343_v25, %v276_v23 }
 0x136   : > { %v553_v27 = vpop.f32.mrf.mxu0 }
 0x137   : > { %v347_v28 = vmul.f32 %v344_v26, %v254_v24 }
 0x139   : > { %v348_v29 = vadd.f32 %v347_v28, %v255_v18 }
 0x13b   : > { %349 = vadd.xlane.f32.xlu0 %v348_v29  ;;  %v351_v30 = vmul.f32 %v348_v29, %v348_v29 }
 0x13f   : > { %352 = vadd.xlane.f32.xlu0 %v351_v30 }
 0x1c4   : > { %v350_v31 = vpop.xlane.xlu0 %349 }
 0x1c5   : > { %v354_v32 = vmul.f32 0.03125, %v350_v31 }
 0x1c7   : > { %v356_v34 = vmul.f32 %v354_v32, %v354_v32  ;;  %v358_v41 = vsub.f32 %v348_v29, %v354_v32 }
 0x1c8   : > { %v353_v33 = vpop.xlane.xlu0 %352 }
 0x1c9   : > { %v355_v35 = vmul.f32 0.03125, %v353_v33 }
 0x1cb   : > { %v357_v36 = vsub.f32 %v355_v35, %v356_v34 }
 0x1cd   : > { %v359_v37 = vadd.f32 1e-05, %v357_v36 }
 0x1cf   : > { %636 = vrsqrt.f32 %v359_v37 }
 0x1dc   : > { %v637_v42 = vpop.eup %636 }
 0x1dd   : > { %v361_v44 = vmul.f32 %v637_v42, %v358_v41 }
 0x1df   : > { %v366_v45 = vmul.f32 %v365_v40, %v361_v44  ;;  %376 = sbr.rel (%p496_p8) target bundleno = 485 (0x1e5), region = 52 }
 0x1e1   : > { %v371_v46 = vadd.f32 %v370_v43, %v366_v45 }
 0x1e3   : > { %372 = vst [vmem:[#allocation2] sm:$0xff] %v371_v46 }
 0x1e4   : > { %377 = vst [vmem:[#allocation9] sm:$0xff] %v371_v46 }
 0x1e5 PF: > { %p580_p1 = scmp.eq.s32.totalorder %s898_s19, 2  ;;  %s811_s20 = smov [#allocation9]  }
 0x1e6   : > { %s387_s30 = sshll.u32 %s811_s20, 4  ;;  %s388_s30 = int_to_ptr.vmem [resolvable:$true] %s387_s30 }
 0x1e7   : > { %s720_s4 = scalar_lea.vmem %s388_s30, 128  ;;  %p727_p11 = scmp.lt.s32.totalorder %s388_s30, %s388_s30 }
 0x1e8   : > { %p721_p3 = scmp.ne.s32.totalorder %s388_s30, %s720_s4  ;;  %p728_p12 = scmp.lt.s32.totalorder %s720_s4, %s720_s4 }
 0x1ea   : > { %p722_p4 = pnand %p721_p3, %p580_p1  ;;  %p729_p13 = por %p728_p12, %p727_p11 }
 0x1ec   : > { %p723_p9 = pneg %p722_p4 }
 0x1ee   : > { %p730_p0 = pnand %p729_p13, %p723_p9 }
 0x1f0   : > { %733 = shalt.err (!%p730_p0)
}
 0x1f1   : > { %563 = dma.vmem_to_hbm [thread:$0]  (%p580_p1), %s388_s30, 128, %s1015_s3, [#allocation5]  }
 0x1f2   : > { %777 = dma.done.wait (%p580_p1), [#allocation5], 128  }
 0x1f3   : > { %779 = vsyncadd (%p580_p1), [#allocation5], 4294967168 }
 0x1f4 PF: > { %s18_s17 = sadd.s32 1, %s802_s17   ;;  %s1027_s12 = smov %s786_s13 }
 0x1f5   : > { %p15_p10 = scmp.ge.s32.totalorder %s18_s17, 5   ;;  %s1028_s13 = smov %s790_s14 }
 0x1f6   : > { %s1029_s14 = smov %s876_s24  ;;  %s1030_s15 = smov %s798_s16 }
 0x1f7   : > { %s1031_s16 = smov %s1033_s18  ;;  %17 = sbr.rel (!%p15_p10) target bundleno = 6 (0x6), region = 95 }
 0x1fc   :  { %400 = vsyncpa [#allocation4], 1 }
 0x1fd   :  { %402 = vsyncpa [#allocation4 + $0x1], 1 }
 0x1fe   :  { %403 = vsyncpa [#allocation7], 1 }
 0x1ff   :  { %405 = vsyncpa [#allocation7 + $0x1], 1 }
 0x200   :  { %406 = vsyncpa [#allocation5], 1 }
 0x201   :  { %408 = vsyncpa [#allocation5 + $0x1], 1 }

</bundles_post_ra>
